<compile_context>
chip_gen: v7x
topology: tpu7x:2x2x1
jax: 0.10.0
libtpu: 0.0.40
codegen_flags: <defaults>
</compile_context>

<pallas_src>
import jax
import jax.numpy as jnp
from jax.experimental import pallas as pl
from jax.experimental.pallas import tpu as pltpu

_LANES = 128
_SUBLANES = 8
_TILE_TARGET_BYTES = 2 << 20  # ~2 MiB per tile


def _copy_kernel(x_ref, o_ref):
    # Identity copy of the current lane-dense VMEM tile.
    o_ref[...] = x_ref[...]


def _resolve_size(size, total):
    """Resolve a single -1 in `size` exactly like torch.Tensor.view."""
    size = tuple(int(s) for s in size)
    if -1 in size:
        known = 1
        for s in size:
            if s != -1:
                known *= s
        assert known != 0 and total % known == 0, "cannot infer -1 dimension"
        size = tuple(total // known if s == -1 else s for s in size)
    prod = 1
    for s in size:
        prod *= s
    assert prod == total, f"view size {size} incompatible with {total} elements"
    return size


def _staging_shape_and_tile(total, itemsize):
    """Pick a lane-dense, sublane-full 2D staging shape + row-tile size."""
    if total % _LANES == 0:
        rows, cols = total // _LANES, _LANES
        # ~2 MiB per tile, rounded down to a multiple of 8 sublanes.
        target = max(_SUBLANES, _TILE_TARGET_BYTES // (cols * itemsize))
        target -= target % _SUBLANES
        if rows % _SUBLANES == 0 and rows > target:
            tile_r = target            # tiled streaming copy
        else:
            tile_r = rows              # whole array fits one (small) block
        return rows, cols, tile_r
    if total % _SUBLANES == 0:
        # Sublane-full fallback: (8, N/8) instead of the vreg-wasting (1, N).
        return _SUBLANES, total // _SUBLANES, _SUBLANES
    # Degenerate last resort (tiny, oddly sized inputs only).
    return 1, total, 1


def _pallas_copy(flat2d, tile_r):
    rows, cols = flat2d.shape
    grid = (pl.cdiv(rows, tile_r),)
    return pl.pallas_call(
        _copy_kernel,
        out_shape=jax.ShapeDtypeStruct((rows, cols), flat2d.dtype),
        grid=grid,
        in_specs=[pl.BlockSpec((tile_r, cols), lambda i: (i, 0))],
        out_specs=pl.BlockSpec((tile_r, cols), lambda i: (i, 0)),
        compiler_params=pltpu.CompilerParams(
            # Copy iterations are independent -> shard across v7x's 2 TCs.
            dimension_semantics=("parallel",),
            # Double-buffered in + out tiles at ~2 MiB each stay far below
            # this on every generation (v7x scoped VMEM included).
            vmem_limit_bytes=32 * 1024 * 1024,
        ),
    )(flat2d)


def pallas_reshape(x: jax.Array, size, materialize: bool = False) -> jax.Array:
    """Equivalent of torch `x.view(size)`.

    materialize=False (default, recommended): metadata-only reshape — exactly
        what torch .view is; zero HBM traffic.
    materialize=True: routes the flattened buffer through a tiled, pipelined
        Pallas streaming-copy kernel before the final (metadata) reshape.
    """
    total = x.size
    out_size = _resolve_size(size, total)

    if not materialize:
        # torch .view is metadata-only; so is jnp.reshape on a contiguous array.
        return jnp.reshape(x, out_size)

    # Row-major flatten (matches torch .view on a contiguous tensor).
    flat = jnp.reshape(x, (-1,))
    rows, cols, tile_r = _staging_shape_and_tile(total, x.dtype.itemsize)
    flat2d = jnp.reshape(flat, (rows, cols))

    copied = _pallas_copy(flat2d, tile_r)

    # Final shape re-interpretation (pure metadata, like torch .view).
    return jnp.reshape(copied, out_size)


class Reshape:
    """Drop-in analogue of the PyTorch Reshape module."""

    def __init__(self, size, materialize: bool = False):
        self.size = size
        self.materialize = materialize

    def __call__(self, x: jax.Array) -> jax.Array:
        return pallas_reshape(x, self.size, materialize=self.materialize)


if __name__ == "__main__":
    key = jax.random.PRNGKey(0)
    # Small NCHW input consistent with a VAE feature map.
    x = jax.random.normal(key, (2, 4, 16, 16), dtype=jnp.float32)

    # Typical use inside the VAE: flatten conv features per batch element.
    target_size = (2, -1)  # -> (2, 1024)
    ref = jnp.reshape(x, (2, 4 * 16 * 16))

    # Recommended zero-copy path (what torch .view actually is).
    out_view = Reshape(target_size)(x)

    # Pallas streaming-copy path (exercises the kernel).
    out_kernel = Reshape(target_size, materialize=True)(x)
    out_kernel = jax.block_until_ready(out_kernel)

    assert out_kernel.shape == ref.shape, (out_kernel.shape, ref.shape)
    assert out_view.shape == ref.shape, (out_view.shape, ref.shape)
    assert out_kernel.dtype == ref.dtype
    assert bool(jnp.array_equal(out_kernel, ref))
    assert bool(jnp.array_equal(out_view, ref))

    # Exercise the sublane-full (8, N/8) fallback (element count not % 128).
    y = jax.random.normal(jax.random.PRNGKey(0), (2, 3, 4, 4), dtype=jnp.float32)
    out_y = jax.block_until_ready(pallas_reshape(y, (6, -1), materialize=True))
    assert bool(jnp.array_equal(out_y, jnp.reshape(y, (6, 16))))

    # Exercise the tiled (multi-grid-step) path with a larger buffer.
    z = jax.random.normal(jax.random.PRNGKey(0), (8, 64, 64, 64), dtype=jnp.float32)
    out_z = jax.block_until_ready(pallas_reshape(z, (8, -1), materialize=True))
    assert bool(jnp.array_equal(out_z, jnp.reshape(z, (8, 64 * 64 * 64))))

    print("KERNEL_OK")
</pallas_src>

<mosaic_0001>
module attributes {stable_mosaic.version = 11 : i64} {
  func.func @_copy_kernel(%arg0: i32, %arg1: memref<16x128xf32, #tpu.memory_space<vmem>>, %arg2: memref<16x128xf32, #tpu.memory_space<vmem>>) attributes {dimension_semantics = [#tpu.dimension_semantics<parallel>], iteration_bounds = array<i64: 1>, scalar_prefetch = 0 : i64, scratch_operands = 0 : i64, tpu.core_type = #tpu.core_type<tc>, window_params = [{transform_indices = @transform_0, window_bounds = array<i64: 16, 128>}, {transform_indices = @transform_1, window_bounds = array<i64: 16, 128>}]} {
    %c0 = arith.constant 0 : index
    %c0_0 = arith.constant 0 : index
    %0 = vector.load %arg1[%c0, %c0_0] : memref<16x128xf32, #tpu.memory_space<vmem>>, vector<16x128xf32>
    %c0_1 = arith.constant 0 : index
    %c0_2 = arith.constant 0 : index
    %1 = vector.load %arg2[%c0_1, %c0_2] : memref<16x128xf32, #tpu.memory_space<vmem>>, vector<16x128xf32>
    tpu.vector_store %arg2[%c0_1, %c0_2], %0 {strides = array<i32>} : memref<16x128xf32, #tpu.memory_space<vmem>>, vector<16x128xf32>,
    return
  }
  func.func @transform_0(%arg0: i32) -> (i32, i32) {
    %c0_i32 = arith.constant 0 : i32
    %c0_i32_0 = arith.constant 0 : i32
    return %arg0, %c0_i32 : i32, i32
  }
  func.func @transform_1(%arg0: i32) -> (i32, i32) {
    %c0_i32 = arith.constant 0 : i32
    %c0_i32_0 = arith.constant 0 : i32
    return %arg0, %c0_i32 : i32, i32
  }
}

</mosaic_0001>

<bundles_post_ra>
// kernel: tpu_custom_call.1
= control target key start
LH: loop header
LB: loop body
LE: loop exit
PB: predicated region body
PF: predicated region fallthrough
CT: control target
= control target key end

     0   :  { %6 = vsyncpa [#allocation3], 0  ;;  %s134_s0 = inlined_call_operand.hbm [shape: f32[16,128], index: 0, kind: input, shape index: {}]   ;;  %s135_s1 = inlined_call_operand.hbm [shape: f32[16,128], index: 1, kind: output, shape index: {}]  }
   0x1   :  { %7 = vsyncpa [#allocation4], 0  ;;  %s96_s6 = smov [#allocation2]   ;;  %s48_s10 = scalar_lea.hbm %s134_s0, 256 }
   0x2   :  { %s13_s7 = sshll.u32 %s96_s6, 4  ;;  %p49_p0 = scmp.ne.s32.totalorder %s134_s0, %s48_s10  ;;  %s14_s7 = int_to_ptr.vmem [resolvable:$true] %s13_s7 }
   0x3   :  { %p52_p1 = scmp.lt.u32.totalorder %s48_s10, %s134_s0 }
   0x5   :  { %p54_p2 = pnand %p52_p1, %p49_p0 }
   0x7   :  { %57 = shalt.err (!%p54_p2)
}
   0x8   :  { %s58_s15 = scalar_lea.vmem %s14_s7, 256  ;;  %p63_p4 = scmp.lt.s32.totalorder %s14_s7, %s14_s7 }
   0x9   :  { %p59_p3 = scmp.ne.s32.totalorder %s14_s7, %s58_s15  ;;  %p64_p5 = scmp.lt.s32.totalorder %s58_s15, %s58_s15 }
   0xb   :  { %p65_p6 = por %p64_p5, %p63_p4 }
   0xd   :  { %p66_p7 = pnand %p65_p6, %p59_p3 }
   0xf   :  { %69 = shalt.err (!%p66_p7)
}
  0x10   :  { %s97_s16 = smov 128   ;;  %s98_s17 = smov 8  }
  0x11   :  { %19 = dma.hbm_to_vmem [thread:$0]  %s134_s0, 256, %s14_s7, [#allocation3], %s97_s16, %s97_s16, %s98_s17  }
  0x12   :  { %92 = dma.done.wait [#allocation3], 256  }
  0x13   :  { %93 = vsyncadd [#allocation3], 4294967040  ;;  %s99_s20 = smov [#allocation5]   ;;  %v23_v0 = vld [vmem:[#allocation2] sm:$0xff]  ;;  %v24_v1 = vld [vmem:[#allocation2 + $0x8] sm:$0xff] }
  0x14   :  { %s32_s21 = sshll.u32 %s99_s20, 4  ;;  %25 = vst [vmem:[#allocation5] sm:$0xff] %v23_v0  ;;  %26 = vst [vmem:[#allocation5 + $0x8] sm:$0xff] %v24_v1  ;;  %s33_s21 = int_to_ptr.vmem [resolvable:$true] %s32_s21 }
  0x15   :  { %s70_s22 = scalar_lea.vmem %s33_s21, 256  ;;  %p75_p9 = scmp.lt.s32.totalorder %s33_s21, %s33_s21 }
  0x16   :  { %p71_p8 = scmp.ne.s32.totalorder %s33_s21, %s70_s22  ;;  %p76_p10 = scmp.lt.s32.totalorder %s70_s22, %s70_s22 }
  0x18   :  { %p77_p11 = por %p76_p10, %p75_p9 }
  0x1a   :  { %p78_p12 = pnand %p77_p11, %p71_p8 }
  0x1c   :  { %81 = shalt.err (!%p78_p12)
}
  0x1d   :  { %s82_s0 = scalar_lea.hbm %s135_s1, 256 }
  0x1e   :  { %p83_p13 = scmp.ne.s32.totalorder %s135_s1, %s82_s0  ;;  %p86_p0 = scmp.lt.u32.totalorder %s82_s0, %s135_s1 }
  0x20   :  { %p88_p1 = pnand %p86_p0, %p83_p13 }
  0x22   :  { %91 = shalt.err (!%p88_p1)
}
  0x23   :  { %38 = dma.vmem_to_hbm [thread:$0]  %s33_s21, 256, %s135_s1, [#allocation4], %s97_s16, %s97_s16, %s98_s17  }
  0x24   :  { %94 = dma.done.wait [#allocation4], 256  }
  0x25   :  { %95 = vsyncadd [#allocation4], 4294967040 }
  0x26   :  { %42 = vsyncpa [#allocation3], 1 }
  0x27   :  { %43 = vsyncpa [#allocation4], 1 }

</bundles_post_ra>
